<compile_context>
chip_gen: v6e
topology: v6e:2x2x1
jax: 0.10.0
libtpu: 0.0.40
codegen_flags: <defaults>
</compile_context>

<pallas_src>
import numpy as np
import jax
import jax.numpy as jnp
from jax import lax
from jax.experimental import pallas as pl
from jax.experimental.pallas import tpu as pltpu

N_QUBITS = 4


# ---------------------------------------------------------------------------
# Pallas kernel: full forward pass for one batch tile, transposed activations
# ---------------------------------------------------------------------------
def hybrid_kernel(x_ref, w1_ref, b1_ref, wr_ref, br_ref, qc_ref,
                  w2e_ref, b2e_ref, w2o_ref, b2o_ref, out_ref):
    # fc1: h1^T = w1^T @ x^T, computed as (128, d_in) x (TB, d_in)^T -> (128, TB).
    # x is cast to bf16 in-kernel (hidden under the matmul); f32 accumulation.
    xb = x_ref[...].astype(jnp.bfloat16)
    h1t = lax.dot_general(w1_ref[...], xb, (((1,), (1,)), ((), ())),
                          preferred_element_type=jnp.float32)        # (128, TB)
    h1t = jnp.maximum(h1t + b1_ref[...], 0.0)                        # b1_ref: (128, 1)

    # fc1_reduce -> tanh, lane-dense (4, TB)
    ang = jnp.dot(wr_ref[...], h1t, preferred_element_type=jnp.float32)   # (4, TB)
    ang = jnp.tanh(ang + br_ref[...])                                 # br_ref: (4, 1)

    # ---- quantum circuit (exact analytic form), one cos per wire ----
    # qc_ref col 0 = R, col 1 = delta (batch-independent, hoisted to wrapper):
    #   z_i = R_i * cos(ang_i + delta_i) = cos(th)*cos(ang) - sin(th)*sin(ph)*sin(ang)
    z = qc_ref[:, 0:1] * jnp.cos(ang + qc_ref[:, 1:2])                # (4, TB)

    z0 = z[0:1, :]
    z1 = z[1:2, :]
    z2 = z[2:3, :]
    z3 = z[3:4, :]
    z01 = z0 * z1
    z012 = z01 * z2
    z0123 = z012 * z3
    z123 = z1 * (z2 * z3)
    # CNOT ring => [<Z0>,<Z1>,<Z2>,<Z3>] = [z123, z01, z012, z0123]
    e_t = jnp.concatenate([z123, z01, z012, z0123], axis=0)           # (4, TB)

    # fc2_expand on the (otherwise idle) MXU; stay transposed -> ReLU
    h2t = jnp.dot(w2e_ref[...], e_t, preferred_element_type=jnp.float32)   # (128, TB)
    h2t = jnp.maximum(h2t + b2e_ref[...], 0.0)                        # b2e_ref: (128, 1)

    # fc2_out -> sigmoid, transposed lane-dense output (out_dim, TB)
    logits = jnp.dot(w2o_ref[...], h2t, preferred_element_type=jnp.float32)
    logits = logits + b2o_ref[...]                                    # b2o_ref: (out_dim, 1)
    out_ref[...] = 1.0 / (1.0 + jnp.exp(-logits))


# ---------------------------------------------------------------------------
# Wrapper: batch grid, resident transposed weights, hoisted quantum constants
# ---------------------------------------------------------------------------
def hybrid_forward(batch, params, *, block_b=1024):
    x = batch['features']
    B, d_in = x.shape
    out_dim = params['w2o'].shape[1]

    # Batch tile: multiple of 128 lanes (unmasked lane-dense output stores) and
    # >= 2 grid steps whenever B allows, so v7x's second TensorCore gets work.
    if B >= 256:
        cap = max(int(block_b) // 128, 1) * 128
        tb = min(cap, ((pl.cdiv(B, 2) + 127) // 128) * 128)
    else:
        tb = B                       # single full-extent block (dims == array dims)
    nb = pl.cdiv(B, tb)

    # Weights: transposed once in the wrapper (tiny, one-time), then VMEM-resident
    # across the whole batch grid.  Only fc1 uses bf16 inputs.
    w1t = params['w1'].T.astype(jnp.bfloat16)    # (128, d_in)
    b1t = params['b1'].T                          # (128, 1)
    wrt = params['wr'].T                          # (4, 128)
    brt = params['br'].T                          # (4, 1)
    w2et = params['w2e'].T                        # (128, 4)
    b2et = params['b2e'].T                        # (128, 1)
    w2ot = params['w2o'].T                        # (out_dim, 128)
    b2ot = params['b2o'].T                        # (out_dim, 1)

    # Batch-independent quantum constants (omega drops out of Z expectations):
    #   A*cos(a) - Bc*sin(a) = R*cos(a + delta),  R = sqrt(A^2+Bc^2), delta = atan2(Bc, A)
    phi = params['qw'][0, :, 0]
    theta = params['qw'][0, :, 1]
    A = jnp.cos(theta)
    Bc = jnp.sin(theta) * jnp.sin(phi)
    R = jnp.sqrt(A * A + Bc * Bc)
    delta = jnp.arctan2(Bc, A)
    qc = jnp.stack([R, delta], axis=1).astype(jnp.float32)   # (4, 2)

    def resident(arr):   # loaded once, stays in VMEM across grid steps
        return pl.BlockSpec(arr.shape, lambda i: (0, 0))

    out_t = pl.pallas_call(
        hybrid_kernel,
        out_shape=jax.ShapeDtypeStruct((out_dim, B), jnp.float32),
        grid=(nb,),
        in_specs=[
            pl.BlockSpec((tb, d_in), lambda i: (i, 0)),   # x: streamed f32, double-buffered
            resident(w1t), resident(b1t),
            resident(wrt), resident(brt),
            resident(qc),
            resident(w2et), resident(b2et),
            resident(w2ot), resident(b2ot),
        ],
        out_specs=pl.BlockSpec((out_dim, tb), lambda i: (0, i)),
        compiler_params=pltpu.CompilerParams(
            dimension_semantics=("parallel",)),
    )(x, w1t, b1t, wrt, brt, qc, w2et, b2et, w2ot, b2ot)

    return out_t.T                                          # (B, out_dim)


# ---------------------------------------------------------------------------
# Pure numpy reference (full complex statevector simulation of the circuit).
# The bf16 rounding of x / w1 (the only dtype reduction vs the f32 model) is
# applied identically here so the comparison stays tight.
# ---------------------------------------------------------------------------
def _sv_expvals(angles, w):
    def RX(a): return np.array([[np.cos(a / 2), -1j * np.sin(a / 2)],
                                [-1j * np.sin(a / 2), np.cos(a / 2)]])
    def RY(a): return np.array([[np.cos(a / 2), -np.sin(a / 2)],
                                [np.sin(a / 2), np.cos(a / 2)]])
    def RZ(a): return np.array([[np.exp(-1j * a / 2), 0],
                                [0, np.exp(1j * a / 2)]])

    n = N_QUBITS
    psi = np.zeros((2,) * n, dtype=np.complex128)
    psi[(0,) * n] = 1.0

    def apply1(U, wire, psi):
        psi = np.moveaxis(psi, wire, 0)
        psi = np.tensordot(U, psi, axes=([1], [0]))
        return np.moveaxis(psi, 0, wire)

    def apply2(U4, c, t, psi):
        psi = np.moveaxis(psi, (c, t), (0, 1))
        shp = psi.shape
        psi = (U4 @ psi.reshape(4, -1)).reshape(shp)
        return np.moveaxis(psi, (0, 1), (c, t))

    for i in range(n):                       # AngleEmbedding (rotation='X')
        psi = apply1(RX(angles[i]), i, psi)
    for i in range(n):                       # StronglyEntanglingLayers rotations
        phi, theta, omega = w[i]
        psi = apply1(RZ(omega) @ RY(theta) @ RZ(phi), i, psi)
    CNOT = np.array([[1, 0, 0, 0], [0, 1, 0, 0], [0, 0, 0, 1], [0, 0, 1, 0]],
                    dtype=np.complex128)
    for i in range(n):                       # entangler ring, range r=1
        psi = apply2(CNOT, i, (i + 1) % n, psi)

    probs = np.abs(psi) ** 2
    ev = []
    for i in range(n):
        p = np.moveaxis(probs, i, 0)
        ev.append(p[0].sum() - p[1].sum())
    return np.array(ev)


def _bf16_round_f64(a):
    return np.asarray(jnp.asarray(a).astype(jnp.bfloat16).astype(jnp.float32),
                      np.float64)


def reference_forward(x, params):
    xq = _bf16_round_f64(x)                                           # matches in-kernel bf16 cast
    w1q = _bf16_round_f64(params['w1'])                               # matches resident bf16 w1
    b1 = np.asarray(params['b1'], np.float64)
    wr, br = np.asarray(params['wr'], np.float64), np.asarray(params['br'], np.float64)
    w2e, b2e = np.asarray(params['w2e'], np.float64), np.asarray(params['b2e'], np.float64)
    w2o, b2o = np.asarray(params['w2o'], np.float64), np.asarray(params['b2o'], np.float64)
    qw = np.asarray(params['qw'], np.float64)[0]                      # (4, 3)

    h1 = np.maximum(xq @ w1q + b1, 0.0)
    ang = np.tanh(h1 @ wr + br)
    e = np.stack([_sv_expvals(a, qw) for a in ang])
    h2 = np.maximum(e @ w2e + b2e, 0.0)
    logits = h2 @ w2o + b2o
    return 1.0 / (1.0 + np.exp(-logits))


# ---------------------------------------------------------------------------
# Deterministic parameter construction + demo
# ---------------------------------------------------------------------------
def init_params(key, input_dim, output_dim):
    ks = jax.random.split(key, 9)

    def linear(kw, kb, fan_in, fan_out):
        bound = 1.0 / np.sqrt(fan_in)
        w = jax.random.uniform(kw, (fan_in, fan_out), jnp.float32, -bound, bound)
        b = jax.random.uniform(kb, (1, fan_out), jnp.float32, -bound, bound)
        return w, b

    w1, b1 = linear(ks[0], ks[1], input_dim, 128)             # fc1
    wr, br = linear(ks[2], ks[3], 128, N_QUBITS)               # fc1_reduce
    qw = jax.random.uniform(ks[4], (1, N_QUBITS, 3), jnp.float32, 0.0, 2.0 * np.pi)
    w2e, b2e = linear(ks[5], ks[6], N_QUBITS, 128)             # fc2_expand
    w2o, b2o = linear(ks[7], ks[8], 128, output_dim)           # fc2_out

    return {
        'w1': w1, 'b1': b1, 'wr': wr, 'br': br,
        'qw': qw,                                              # (1, 4, 3)
        'w2e': w2e, 'b2e': b2e, 'w2o': w2o, 'b2o': b2o,
    }


if __name__ == "__main__":
    B, INPUT_DIM, OUTPUT_DIM = 256, 32, 2                      # grid = (2,) with tb = 128

    key = jax.random.PRNGKey(0)
    pkey, xkey = jax.random.split(key)
    params = init_params(pkey, INPUT_DIM, OUTPUT_DIM)
    x = jax.random.normal(xkey, (B, INPUT_DIM), jnp.float32)
    batch = {'features': x}

    out = hybrid_forward(batch, params, block_b=1024)
    out = jax.block_until_ready(out)

    ref = reference_forward(np.asarray(x), params)
    np.testing.assert_allclose(np.asarray(out), ref, rtol=1e-3, atol=5e-5)

    print("KERNEL_OK")
</pallas_src>

<mosaic_0001>
module attributes {stable_mosaic.version = 11 : i64} {
  func.func @hybrid_kernel(%arg0: i32, %arg1: memref<128x32xf32, #tpu.memory_space<vmem>>, %arg2: memref<128x32xbf16, #tpu.memory_space<vmem>>, %arg3: memref<128x1xf32, #tpu.memory_space<vmem>>, %arg4: memref<4x128xf32, #tpu.memory_space<vmem>>, %arg5: memref<4x1xf32, #tpu.memory_space<vmem>>, %arg6: memref<4x2xf32, #tpu.memory_space<vmem>>, %arg7: memref<128x4xf32, #tpu.memory_space<vmem>>, %arg8: memref<128x1xf32, #tpu.memory_space<vmem>>, %arg9: memref<2x128xf32, #tpu.memory_space<vmem>>, %arg10: memref<2x1xf32, #tpu.memory_space<vmem>>, %arg11: memref<2x128xf32, #tpu.memory_space<vmem>>) attributes {dimension_semantics = [#tpu.dimension_semantics<parallel>], iteration_bounds = array<i64: 2>, scalar_prefetch = 0 : i64, scratch_operands = 0 : i64, tpu.core_type = #tpu.core_type<tc>, window_params = [{transform_indices = @transform_0, window_bounds = array<i64: 128, 32>}, {pipeline_mode = #tpu.pipeline_mode<synchronous>, transform_indices = @transform_1, window_bounds = array<i64: 128, 32>}, {pipeline_mode = #tpu.pipeline_mode<synchronous>, transform_indices = @transform_2, window_bounds = array<i64: 128, 1>}, {pipeline_mode = #tpu.pipeline_mode<synchronous>, transform_indices = @transform_3, window_bounds = array<i64: 4, 128>}, {pipeline_mode = #tpu.pipeline_mode<synchronous>, transform_indices = @transform_4, window_bounds = array<i64: 4, 1>}, {pipeline_mode = #tpu.pipeline_mode<synchronous>, transform_indices = @transform_5, window_bounds = array<i64: 4, 2>}, {pipeline_mode = #tpu.pipeline_mode<synchronous>, transform_indices = @transform_6, window_bounds = array<i64: 128, 4>}, {pipeline_mode = #tpu.pipeline_mode<synchronous>, transform_indices = @transform_7, window_bounds = array<i64: 128, 1>}, {pipeline_mode = #tpu.pipeline_mode<synchronous>, transform_indices = @transform_8, window_bounds = array<i64: 2, 128>}, {pipeline_mode = #tpu.pipeline_mode<synchronous>, transform_indices = @transform_9, window_bounds = array<i64: 2, 1>}, {transform_indices = @transform_10, window_bounds = array<i64: 2, 128>}]} {
    %c0 = arith.constant 0 : index
    %c0_0 = arith.constant 0 : index
    %0 = vector.load %arg1[%c0, %c0_0] : memref<128x32xf32, #tpu.memory_space<vmem>>, vector<128x32xf32>
    %1 = arith.truncf %0 : vector<128x32xf32> to vector<128x32xbf16>
    %c0_1 = arith.constant 0 : index
    %c0_2 = arith.constant 0 : index
    %2 = vector.load %arg2[%c0_1, %c0_2] : memref<128x32xbf16, #tpu.memory_space<vmem>>, vector<128x32xbf16>
    %cst = arith.constant dense<0.000000e+00> : vector<128x128xf32>
    %3 = tpu.matmul %2, %1, %cst {dimension_numbers = #tpu.dot_dimension_numbers<[1], [1], [0], [0], [0, 0, 1, 0], [], []>} : vector<128x32xbf16>, vector<128x32xbf16>, vector<128x128xf32> -> vector<128x128xf32>
    %c0_3 = arith.constant 0 : index
    %c0_4 = arith.constant 0 : index
    %4 = vector.load %arg3[%c0_3, %c0_4] : memref<128x1xf32, #tpu.memory_space<vmem>>, vector<128x1xf32>
    %5 = vector.broadcast %4 : vector<128x1xf32> to vector<128x128xf32>
    %6 = arith.addf %3, %5 : vector<128x128xf32>
    %cst_5 = arith.constant 0.000000e+00 : f32
    %7 = vector.broadcast %cst_5 : f32 to vector<128x128xf32>
    %8 = arith.maximumf %6, %7 : vector<128x128xf32>
    %c0_6 = arith.constant 0 : index
    %c0_7 = arith.constant 0 : index
    %9 = vector.load %arg4[%c0_6, %c0_7] : memref<4x128xf32, #tpu.memory_space<vmem>>, vector<4x128xf32>
    %cst_8 = arith.constant dense<0.000000e+00> : vector<4x128xf32>
    %10 = tpu.matmul %9, %8, %cst_8 {dimension_numbers = #tpu.dot_dimension_numbers<[1], [0], [0], [1], [0, 0, 1, 1], [], []>} : vector<4x128xf32>, vector<128x128xf32>, vector<4x128xf32> -> vector<4x128xf32>
    %c0_9 = arith.constant 0 : index
    %c0_10 = arith.constant 0 : index
    %11 = vector.load %arg5[%c0_9, %c0_10] : memref<4x1xf32, #tpu.memory_space<vmem>>, vector<4x1xf32>
    %12 = vector.broadcast %11 : vector<4x1xf32> to vector<4x128xf32>
    %13 = arith.addf %10, %12 : vector<4x128xf32>
    %14 = math.tanh %13 : vector<4x128xf32>
    %c0_11 = arith.constant 0 : index
    %c0_12 = arith.constant 0 : index
    %15 = vector.load %arg6[%c0_11, %c0_12] : memref<4x2xf32, #tpu.memory_space<vmem>>, vector<4x1xf32>
    %c0_13 = arith.constant 0 : index
    %c1 = arith.constant 1 : index
    %16 = vector.load %arg6[%c0_13, %c1] : memref<4x2xf32, #tpu.memory_space<vmem>>, vector<4x1xf32>
    %17 = vector.broadcast %16 : vector<4x1xf32> to vector<4x128xf32>
    %18 = arith.addf %14, %17 : vector<4x128xf32>
    %19 = math.cos %18 : vector<4x128xf32>
    %20 = vector.broadcast %15 : vector<4x1xf32> to vector<4x128xf32>
    %21 = arith.mulf %20, %19 : vector<4x128xf32>
    %22 = vector.extract_strided_slice %21 {offsets = [0, 0], sizes = [1, 128], strides = [1, 1]} : vector<4x128xf32> to vector<1x128xf32>
    %23 = vector.extract_strided_slice %21 {offsets = [1, 0], sizes = [1, 128], strides = [1, 1]} : vector<4x128xf32> to vector<1x128xf32>
    %24 = vector.extract_strided_slice %21 {offsets = [2, 0], sizes = [1, 128], strides = [1, 1]} : vector<4x128xf32> to vector<1x128xf32>
    %25 = vector.extract_strided_slice %21 {offsets = [3, 0], sizes = [1, 128], strides = [1, 1]} : vector<4x128xf32> to vector<1x128xf32>
    %26 = arith.mulf %22, %23 : vector<1x128xf32>
    %27 = arith.mulf %26, %24 : vector<1x128xf32>
    %28 = arith.mulf %27, %25 : vector<1x128xf32>
    %29 = arith.mulf %24, %25 : vector<1x128xf32>
    %30 = arith.mulf %23, %29 : vector<1x128xf32>
    %31 = tpu.concatenate %30, %26, %27, %28 in 0 : vector<1x128xf32>, vector<1x128xf32>, vector<1x128xf32>, vector<1x128xf32> -> vector<4x128xf32>
    %c0_14 = arith.constant 0 : index
    %c0_15 = arith.constant 0 : index
    %32 = vector.load %arg7[%c0_14, %c0_15] : memref<128x4xf32, #tpu.memory_space<vmem>>, vector<128x4xf32>
    %cst_16 = arith.constant dense<0.000000e+00> : vector<128x128xf32>
    %33 = tpu.matmul %32, %31, %cst_16 {dimension_numbers = #tpu.dot_dimension_numbers<[1], [0], [0], [1], [0, 0, 1, 1], [], []>} : vector<128x4xf32>, vector<4x128xf32>, vector<128x128xf32> -> vector<128x128xf32>
    %c0_17 = arith.constant 0 : index
    %c0_18 = arith.constant 0 : index
    %34 = vector.load %arg8[%c0_17, %c0_18] : memref<128x1xf32, #tpu.memory_space<vmem>>, vector<128x1xf32>
    %35 = vector.broadcast %34 : vector<128x1xf32> to vector<128x128xf32>
    %36 = arith.addf %33, %35 : vector<128x128xf32>
    %cst_19 = arith.constant 0.000000e+00 : f32
    %37 = vector.broadcast %cst_19 : f32 to vector<128x128xf32>
    %38 = arith.maximumf %36, %37 : vector<128x128xf32>
    %c0_20 = arith.constant 0 : index
    %c0_21 = arith.constant 0 : index
    %39 = vector.load %arg9[%c0_20, %c0_21] : memref<2x128xf32, #tpu.memory_space<vmem>>, vector<2x128xf32>
    %cst_22 = arith.constant dense<0.000000e+00> : vector<2x128xf32>
    %40 = tpu.matmul %39, %38, %cst_22 {dimension_numbers = #tpu.dot_dimension_numbers<[1], [0], [0], [1], [0, 0, 1, 1], [], []>} : vector<2x128xf32>, vector<128x128xf32>, vector<2x128xf32> -> vector<2x128xf32>
    %c0_23 = arith.constant 0 : index
    %c0_24 = arith.constant 0 : index
    %41 = vector.load %arg10[%c0_23, %c0_24] : memref<2x1xf32, #tpu.memory_space<vmem>>, vector<2x1xf32>
    %42 = vector.broadcast %41 : vector<2x1xf32> to vector<2x128xf32>
    %43 = arith.addf %40, %42 : vector<2x128xf32>
    %cst_25 = arith.constant 0.000000e+00 : f32
    %44 = vector.broadcast %cst_25 : f32 to vector<2x128xf32>
    %45 = arith.subf %44, %43 : vector<2x128xf32>
    %46 = math.exp %45 : vector<2x128xf32>
    %cst_26 = arith.constant 1.000000e+00 : f32
    %47 = vector.broadcast %cst_26 : f32 to vector<2x128xf32>
    %48 = arith.addf %47, %46 : vector<2x128xf32>
    %cst_27 = arith.constant 1.000000e+00 : f32
    %49 = vector.broadcast %cst_27 : f32 to vector<2x128xf32>
    %50 = arith.divf %49, %48 : vector<2x128xf32>
    %c0_28 = arith.constant 0 : index
    %c0_29 = arith.constant 0 : index
    %51 = vector.load %arg11[%c0_28, %c0_29] : memref<2x128xf32, #tpu.memory_space<vmem>>, vector<2x128xf32>
    tpu.vector_store %arg11[%c0_28, %c0_29], %50 {strides = array<i32>} : memref<2x128xf32, #tpu.memory_space<vmem>>, vector<2x128xf32>,
    return
  }
  func.func @transform_0(%arg0: i32) -> (i32, i32) {
    %c0_i32 = arith.constant 0 : i32
    %c0_i32_0 = arith.constant 0 : i32
    return %arg0, %c0_i32 : i32, i32
  }
  func.func @transform_1(%arg0: i32) -> (i32, i32) {
    %c0_i32 = arith.constant 0 : i32
    %c0_i32_0 = arith.constant 0 : i32
    %c0_i32_1 = arith.constant 0 : i32
    return %c0_i32, %c0_i32_0 : i32, i32
  }
  func.func @transform_2(%arg0: i32) -> (i32, i32) {
    %c0_i32 = arith.constant 0 : i32
    %c0_i32_0 = arith.constant 0 : i32
    %c0_i32_1 = arith.constant 0 : i32
    return %c0_i32, %c0_i32_0 : i32, i32
  }
  func.func @transform_3(%arg0: i32) -> (i32, i32) {
    %c0_i32 = arith.constant 0 : i32
    %c0_i32_0 = arith.constant 0 : i32
    %c0_i32_1 = arith.constant 0 : i32
    return %c0_i32, %c0_i32_0 : i32, i32
  }
  func.func @transform_4(%arg0: i32) -> (i32, i32) {
    %c0_i32 = arith.constant 0 : i32
    %c0_i32_0 = arith.constant 0 : i32
    %c0_i32_1 = arith.constant 0 : i32
    return %c0_i32, %c0_i32_0 : i32, i32
  }
  func.func @transform_5(%arg0: i32) -> (i32, i32) {
    %c0_i32 = arith.constant 0 : i32
    %c0_i32_0 = arith.constant 0 : i32
    %c0_i32_1 = arith.constant 0 : i32
    return %c0_i32, %c0_i32_0 : i32, i32
  }
  func.func @transform_6(%arg0: i32) -> (i32, i32) {
    %c0_i32 = arith.constant 0 : i32
    %c0_i32_0 = arith.constant 0 : i32
    %c0_i32_1 = arith.constant 0 : i32
    return %c0_i32, %c0_i32_0 : i32, i32
  }
  func.func @transform_7(%arg0: i32) -> (i32, i32) {
    %c0_i32 = arith.constant 0 : i32
    %c0_i32_0 = arith.constant 0 : i32
    %c0_i32_1 = arith.constant 0 : i32
    return %c0_i32, %c0_i32_0 : i32, i32
  }
  func.func @transform_8(%arg0: i32) -> (i32, i32) {
    %c0_i32 = arith.constant 0 : i32
    %c0_i32_0 = arith.constant 0 : i32
    %c0_i32_1 = arith.constant 0 : i32
    return %c0_i32, %c0_i32_0 : i32, i32
  }
  func.func @transform_9(%arg0: i32) -> (i32, i32) {
    %c0_i32 = arith.constant 0 : i32
    %c0_i32_0 = arith.constant 0 : i32
    %c0_i32_1 = arith.constant 0 : i32
    return %c0_i32, %c0_i32_0 : i32, i32
  }
  func.func @transform_10(%arg0: i32) -> (i32, i32) {
    %c0_i32 = arith.constant 0 : i32
    %c0_i32_0 = arith.constant 0 : i32
    return %c0_i32, %arg0 : i32, i32
  }
}

</mosaic_0001>

<bundles_post_ra>
// kernel: tpu_custom_call.1
= control target key start
LH: loop header
LB: loop body
LE: loop exit
PB: predicated region body
PF: predicated region fallthrough
CT: control target
= control target key end

     0   :  { %s2277_s0 = inlined_call_operand.vmem [shape: f32[256,32], index: 0, kind: input, shape index: {}]   ;;  %s2278_s1 = inlined_call_operand.vmem [shape: bf16[128,32], index: 1, kind: input, shape index: {}]   ;;  %s2279_s2 = inlined_call_operand.vmem [shape: f32[128,1], index: 2, kind: input, shape index: {}]   ;;  %s2280_s3 = inlined_call_operand.vmem [shape: f32[4,128], index: 3, kind: input, shape index: {}]   ;;  %s2281_s4 = inlined_call_operand.vmem [shape: f32[4,1], index: 4, kind: input, shape index: {}]   ;;  %s2282_s5 = inlined_call_operand.vmem [shape: f32[4,2], index: 5, kind: input, shape index: {}]   ;;  %s2283_s6 = inlined_call_operand.vmem [shape: f32[128,4], index: 6, kind: input, shape index: {}]   ;;  %s2284_s7 = inlined_call_operand.vmem [shape: f32[128,1], index: 7, kind: input, shape index: {}]   ;;  %s2285_s8 = inlined_call_operand.vmem [shape: f32[2,128], index: 8, kind: input, shape index: {}]   ;;  %s2286_s9 = inlined_call_operand.vmem [shape: f32[2,1], index: 9, kind: input, shape index: {}]   ;;  %s2287_s10 = inlined_call_operand.hbm [shape: f32[2,256], index: 10, kind: output, shape index: {}]  }
   0x1   :  { %2288 = sst [smem:[#allocation5_spill]] %s2277_s0 }
   0x2   :  { %15 = vsyncpa [#allocation3], 0 }
   0x3   :  { %17 = vsyncpa [#allocation3 + $0x1], 0  ;;  %s1860_s13 = smov 0   ;;  %s1862_s14 = smov 0  }
   0x4   :  { %s1864_s15 = smov 0   ;;  %s1866_s16 = smov 0  }
   0x5 LB: > { %s1881_s17 = sadd.s32 4294967295, %s1792_s16   ;;  %s1406_s18 = sadd.s32 4294967294, %s1792_s16   ;;  %s1792_s16 = sphi %s1866_s16, %s2295_s16   ;;  %s1788_s15 = sphi %s1864_s15, %s2294_s15   ;;  %s1784_s14 = sphi %s1862_s14, %s2293_s14   ;;  %s1780_s13 = sphi %s1860_s13, %s2292_s13  }
   0x6   : > { %s1885_s19 = sadd.s32 1, %s1792_s16   ;;  %s245_s20 = sadd.s32 1, %s1788_s15 }
   0x7   : > { %s242_s21 = ssub.s32 %s1792_s16, %s1885_s19  ;;  %p255_p0 = scmp.ne.s32.totalorder %s1788_s15, %s1784_s14 }
   0x8   : > { %p243_p1 = scmp.eq.s32.totalorder %s242_s21, 0  ;;  %p256_p2 = scmp.eq.s32.totalorder %s1881_s17, 1 }
   0x9   : > { %p261_p3 = scmp.ne.s32.totalorder %s1784_s14, %s1780_s13  ;;  %p262_p4 = scmp.eq.s32.totalorder %s1406_s18, 1 }
   0xa   : > { %s1896_s22 = scalar_select %p243_p1, %s1788_s15, %s245_s20  }
   0xb   : > { %p1898_p5 = por %p256_p2, %p255_p0  ;;  %p1902_p6 = por %p262_p4, %p261_p3 }
   0xc   : > { %p1409_p7 = scmp.ge.s32.totalorder %s1792_s16, 1  ;;  %p316_p8 = scmp.lt.s32.totalorder %s1792_s16, 3 }
   0xe   : > { %p317_p9 = pnand %p1409_p7, %p316_p8 }
   0xf   : > { %s1411_s25 = sshll.u32 (!%p317_p9), %s1881_s17, 4  ;;  %s2291_s0 = sld [smem:[#allocation5_spill]] (!%p317_p9) }
  0x10   : > { %320 = sbr.rel (%p317_p9) target bundleno = 1155 (0x483), region = 60  ;;  %p355_p10 = scmp.lt.s32.totalorder (!%p317_p9), %s1411_s25, 31 }
  0x11   : > { %s351_s21 = sand.u32 (!%p317_p9), 1, %s1784_s14   ;;  %s1804_s20 = smov (!%p317_p9), [#allocation2]  }
  0x12   : > { %s1334_s12 = scalar_lea.sflag (!%p317_p9), [#allocation3], %s351_s21 }
  0x15   : > { %v1714_v0 = vld [vmem:[%s2278_s1] sm:$0xff]   ;;  %vm537_vm0 = vcmask 261120   ;;  %s2297_s25 = smov (!%p355_p10, %s1411_s25), 31  ;;  %v1794_v1 = vmov 0   ;;  %v416_v11 = vld [vmem:[%s2279_s2 + $0x78] sm:$0xff]  ;;  %v415_v12 = vld [vmem:[%s2279_s2 + $0x70] sm:$0xff] }
  0x16   : > { %1537 = vmatprep.mubr.msk.bf16.mxu0 %vm537_vm0, %v1714_v0  ;;  %1710 = vset.pattern.permute.xlu0 %v1794_v1  ;;  %s1412_s28 = sshll.u32 %s2297_s25, 3  ;;  %v414_v13 = vld [vmem:[%s2279_s2 + $0x68] sm:$0xff]  ;;  %v413_v16 = vld [vmem:[%s2279_s2 + $0x60] sm:$0xff]  ;;  %v412_v17 = vld [vmem:[%s2279_s2 + $0x58] sm:$0xff]  ;;  %vm1796_vm1 = vmmov 0   ;;  %vm1035_vm2 = vcmask 31744  }
  0x17   : > { %1711 = vset.pattern.permute.xlu1 %v1794_v1  ;;  %s1918_s11 = scalar_lea.vmem %s2291_s0, %s1412_s28  ;;  %494 = vperm.xlu0 %1710, %v416_v11   ;;  %v411_v20 = vld [vmem:[%s2279_s2 + $0x50] sm:$0xff]  ;;  %v410_v21 = vld [vmem:[%s2279_s2 + $0x48] sm:$0xff]  ;;  %v409_v24 = vld [vmem:[%s2279_s2 + $0x40] sm:$0xff]  ;;  %s1451_s25 = sshll.u32 %s1881_s17, 5 }
  0x18   : > { %v375_v2 = vld [vmem:[%s1918_s11 + $0x70] sm:$0xff]  ;;  %v376_v3 = vld [vmem:[%s1918_s11 + $0x78] sm:$0xff]  ;;  %v373_v4 = vld [vmem:[%s1918_s11 + $0x60] sm:$0xff]  ;;  %484 = vperm.xlu1 %1711, %v414_v13   ;;  %s2242_s30 = scalar_lea.hbm %s2287_s10, %s1451_s25  ;;  %s1736_s0 = sshll.u32 %s1804_s20, 4  ;;  %s1737_s0 = int_to_ptr.vmem [resolvable:$false] %s1736_s0 }
  0x19   : > { %v384_v5 = vpack.c.bf16 %v376_v3, %v375_v2  ;;  %v374_v6 = vld [vmem:[%s1918_s11 + $0x68] sm:$0xff]  ;;  %v371_v9 = vld [vmem:[%s1918_s11 + $0x50] sm:$0xff]  ;;  %v372_v10 = vld [vmem:[%s1918_s11 + $0x58] sm:$0xff]  ;;  %s1738_s17 = scalar_lea.vmem %s1737_s0, 64 }
  0x1a   : > { %v383_v7 = vpack.c.bf16 %v374_v6, %v373_v4  ;;  %v382_v15 = vpack.c.bf16 %v372_v10, %v371_v9  ;;  %v369_v18 = vld [vmem:[%s1918_s11 + $0x40] sm:$0xff]  ;;  %v370_v19 = vld [vmem:[%s1918_s11 + $0x48] sm:$0xff]  ;;  %v408_v25 = vld [vmem:[%s2279_s2 + $0x38] sm:$0xff]  ;;  %v1795_v4 = vmov 0.0  }
  0x1b   : > { %1649 = vmatprep.subr.msk.bf16.mxu0 %vm537_vm0, %v384_v5  ;;  %v584_v8 = vsel %vm537_vm0, %v384_v5, 0  ;;  %489 = vperm.xlu0 %1710, %v415_v12   ;;  %v381_v23 = vpack.c.bf16 %v370_v19, %v369_v18  ;;  %v367_v26 = vld [vmem:[%s1918_s11 + $0x30] sm:$0xff]  ;;  %v368_v27 = vld [vmem:[%s1918_s11 + $0x38] sm:$0xff]  ;;  %v406_v29 = vld [vmem:[%s2279_s2 + $0x28] sm:$0xff]  ;;  %v1797_v5 = vmov 1  }
  0x1c   : > { %1522 = vmatpush3.bf16.xpose.msra.mxu0 %v584_v8  ;;  %v581_v14 = vsel %vm537_vm0, %v383_v7, 0  ;;  %479 = vperm.xlu1 %1711, %v413_v16   ;;  %v578_v22 = vsel %vm537_vm0, %v382_v15, 0  ;;  %v407_v28 = vld [vmem:[%s2279_s2 + $0x30] sm:$0xff]  ;;  %v380_v31 = vpack.c.bf16 %v368_v27, %v367_v26  ;;  %v405_v32 = vld [vmem:[%s2279_s2 + $0x20] sm:$0xff]  ;;  %v404_v33 = vld [vmem:[%s2279_s2 + $0x18] sm:$0xff] }
  0x1d   : > { %1650 = vmatprep.subr.msk.bf16.mxu0 %vm537_vm0, %v383_v7  ;;  %v575_v30 = vsel %vm537_vm0, %v381_v23, 0  ;;  %v365_v34 = vld [vmem:[%s1918_s11 + $0x20] sm:$0xff]  ;;  %v366_v35 = vld [vmem:[%s1918_s11 + $0x28] sm:$0xff]  ;;  %v403_v36 = vld [vmem:[%s2279_s2 + $0x10] sm:$0xff]  ;;  %1553 = vmatprep.subr.mxu1 %v1795_v4 }
  0x1e   : > { %v402_v37 = vld [vmem:[%s2279_s2 + $0x8] sm:$0xff]  ;;  %v572_v38 = vsel %vm537_vm0, %v380_v31, 0  ;;  %v379_v39 = vpack.c.bf16 %v366_v35, %v365_v34  ;;  %v401_v40 = vld [vmem:[%s2279_s2] sm:$0xff]  ;;  %v363_v42 = vld [vmem:[%s1918_s11 + $0x10] sm:$0xff]  ;;  %1585 = vmatprep.mubr.msk.f32.mxu1 %vm1796_vm1, %v1795_v4 }
  0x1f   : > { %474 = vperm.xlu0 %1710, %v412_v17   ;;  %v700_v41 = vld [vmem:[%s2281_s4] sm:$0xf]  ;;  %v364_v43 = vld [vmem:[%s1918_s11 + $0x18] sm:$0xff]  ;;  %v953_v47 = vld [vmem:[%s2284_s7 + $0x70] sm:$0xff] }
  0x20   : > { %469 = vperm.xlu1 %1711, %v411_v20   ;;  %v777_v44 = vld [vmem:[%s2282_s5] sm:$0xf]  ;;  %v569_v45 = vsel %vm537_vm0, %v379_v39, 0  ;;  %v378_v46 = vpack.c.bf16 %v364_v43, %v363_v42  ;;  %v362_v49 = vld [vmem:[%s1918_s11 + $0x8] sm:$0xff]  ;;  %v949_v53 = vld [vmem:[%s2284_s7 + $0x50] sm:$0xff] }
  0x21   : > { %v361_v48 = vld [vmem:[%s1918_s11] sm:$0xff]  ;;  %v945_v56 = vld [vmem:[%s2284_s7 + $0x30] sm:$0xff]  ;;  %v1715_v57 = vld [vmem:[%s2278_s1 + $0x8] sm:$0xff]   ;;  %s1410_s11 = sshll.u32 %s351_s21, 1 }
  0x22   : > { %v951_v50 = vld [vmem:[%s2284_s7 + $0x60] sm:$0xff]  ;;  %v566_v51 = vsel %vm537_vm0, %v378_v46, 0  ;;  %v377_v52 = vpack.c.bf16 %v362_v49, %v361_v48  ;;  %v1716_v58 = vld [vmem:[%s2278_s1 + $0x10] sm:$0xff]   ;;  %v1717_v61 = vld [vmem:[%s2278_s1 + $0x18] sm:$0xff]   ;;  %s353_s26 = scalar_lea.vmem [#allocation2], %s1410_s11 }
  0x23   : > { %464 = vperm.xlu0 %1710, %v410_v21   ;;  %v947_v54 = vld [vmem:[%s2284_s7 + $0x40] sm:$0xff]  ;;  %v941_v60 = vld [vmem:[%s2284_s7 + $0x10] sm:$0xff]  ;;  %v1719_v0 = vld [vmem:[%s2278_s1 + $0x28] sm:$0xff]   ;;  %s1347_s27 = sshll.u32 %s353_s26, 4  ;;  %s1348_s27 = int_to_ptr.vmem [resolvable:$true] %s1347_s27 }
  0x24   : > { %1524 = vmatpush3.bf16.xpose.msra.mxu0 %v581_v14  ;;  %459 = vperm.xlu1 %1711, %v409_v24   ;;  %v563_v55 = vsel %vm537_vm0, %v377_v52, 0  ;;  %v943_v59 = vld [vmem:[%s2284_s7 + $0x20] sm:$0xff]  ;;  %v1720_v2 = vld [vmem:[%s2278_s1 + $0x30] sm:$0xff]   ;;  %v1721_v3 = vld [vmem:[%s2278_s1 + $0x38] sm:$0xff]   ;;  %s1732_s18 = scalar_lea.vmem %s1348_s27, 32  ;;  %p1739_p0 = scmp.lt.s32.totalorder %s1348_s27, %s1737_s0 }
  0x25   : > { %1651 = vmatprep.subr.msk.bf16.mxu0 %vm537_vm0, %v382_v15  ;;  %v1718_v62 = vld [vmem:[%s2278_s1 + $0x20] sm:$0xff]   ;;  %p1733_p11 = scmp.ne.s32.totalorder %s1348_s27, %s1732_s18  ;;  %p1740_p1 = scmp.lt.s32.totalorder %s1738_s17, %s1732_s18 }
  0x26   : > { %v939_v63 = vld [vmem:[%s2284_s7] sm:$0xff] }
  0x27   : > { %454 = vperm.xlu0 %1710, %v408_v25   ;;  %p1734_p12 = pnand %p1733_p11, %p1898_p5  ;;  %p1741_p2 = por %p1740_p1, %p1739_p0 }
  0x28   : > { %449 = vperm.xlu1 %1711, %v407_v28  }
  0x29   : > { %p1735_p13 = pneg %p1734_p12 }
  0x2b   : > { %444 = vperm.xlu0 %1710, %v406_v29   ;;  %p1742_p3 = pnand %p1741_p2, %p1735_p13 }
  0x2c   : > { %1526 = vmatpush3.bf16.xpose.msra.mxu0 %v578_v22  ;;  %439 = vperm.xlu1 %1711, %v405_v32  }
  0x2d   : > { %1652 = vmatprep.subr.msk.bf16.mxu0 %vm537_vm0, %v381_v23 }
  0x2f   : > { %434 = vperm.xlu0 %1710, %v404_v33  }
  0x30   : > { %429 = vperm.xlu1 %1711, %v403_v36  }
  0x33   : > { %424 = vperm.xlu0 %1710, %v402_v37  }
  0x34   : > { %1528 = vmatpush3.bf16.xpose.msra.mxu0 %v575_v30  ;;  %419 = vperm.xlu1 %1711, %v401_v40  }
  0x35   : > { %1653 = vmatprep.subr.msk.bf16.mxu0 %vm537_vm0, %v380_v31 }
  0x37   : > { %703 = vperm.xlu0 %1710, %v700_v41  }
  0x38   : > { %1712 = vset.pattern.permute.xlu1 %v1797_v5 }
  0x39   : > { %780 = vperm.xlu1 %1712, %v777_v44  }
  0x3b   : > { %888 = vperm.xlu0 %1710, %v777_v44  }
  0x3c   : > { %1530 = vmatpush3.bf16.xpose.msra.mxu0 %v572_v38 }
  0x3d   : > { %1654 = vmatprep.subr.msk.bf16.mxu0 %vm537_vm0, %v379_v39  ;;  %1713 = vset.pattern.permute.xlu1 %v1794_v1 }
  0x3f   : > { %1027 = vperm.xlu0 %1710, %v953_v47  }
  0x43   : > { %1017 = vperm.xlu0 %1710, %v951_v50  }
  0x44   : > { %1532 = vmatpush3.bf16.xpose.msra.mxu0 %v569_v45 }
  0x45   : > { %1655 = vmatprep.subr.msk.bf16.mxu0 %vm537_vm0, %v378_v46 }
  0x47   : > { %1007 = vperm.xlu0 %1710, %v949_v53  }
  0x4b   : > { %997 = vperm.xlu0 %1710, %v947_v54  }
  0x4c   : > { %1534 = vmatpush3.bf16.xpose.msra.mxu0 %v566_v51 }
  0x4d   : > { %1656 = vmatprep.subr.msk.bf16.mxu0 %vm537_vm0, %v377_v52 }
  0x4f   : > { %987 = vperm.xlu0 %1710, %v945_v56  }
  0x53   : > { %977 = vperm.xlu0 %1710, %v943_v59  }
  0x54   : > { %1536 = vmatpush3.bf16.xpose.msra.mxu0 %v563_v55 }
  0x57   : > { %967 = vperm.xlu0 %1710, %v941_v60  }
  0x5b   : > { %1538 = vmatmul.mubr.msk.bf16.vlgmr.msra.gmra.mxu0 %vm537_vm0, %v1715_v57  ;;  %957 = vperm.xlu0 %1710, %v939_v63  }
  0x5c   : > { %1541 = vmatprep.mubr.msk.bf16.mxu0 %vm537_vm0, %v1716_v58 }
  0x63   : > { %1542 = vmatmul.mubr.msk.bf16.gmra.mxu0 %vm537_vm0, %v1717_v61 }
  0x64   : > { %1545 = vmatprep.mubr.msk.bf16.mxu0 %vm537_vm0, %v1718_v62 }
  0x6b   : > { %1546 = vmatmul.mubr.msk.bf16.gmra.mxu0 %vm537_vm0, %v1719_v0 }
  0x6c   : > { %1549 = vmatprep.mubr.msk.bf16.mxu0 %vm537_vm0, %v1720_v2 }
  0x73   : > { %1550 = vmatmul.mubr.msk.bf16.gmra.mxu0 %vm537_vm0, %v1721_v3  ;;  %vm917_vm0 = vcmask 1040384  }
  0x92   : > { %v495_v12 = vpop.permute.xlu0 %494 }
  0x93   : > { %v485_v13 = vpop.permute.xlu1 %484 }
  0x96   : > { %v490_v17 = vpop.permute.xlu0 %489 }
  0x97   : > { %v480_v18 = vpop.permute.xlu1 %479 }
  0x9a   : > { %v475_v21 = vpop.permute.xlu0 %474 }
  0x9b   : > { %v470_v22 = vpop.permute.xlu1 %469 }
  0x9e   : > { %v465_v26 = vpop.permute.xlu0 %464 }
  0x9f   : > { %v460_v29 = vpop.permute.xlu1 %459 }
  0xa2   : > { %v455_v37 = vpop.permute.xlu0 %454 }
  0xa3   : > { %v450_v38 = vpop.permute.xlu1 %449 }
  0xa6   : > { %v445_v45 = vpop.permute.xlu0 %444 }
  0xa7   : > { %v440_v46 = vpop.permute.xlu1 %439 }
  0xaa   : > { %v435_v53 = vpop.permute.xlu0 %434 }
  0xab   : > { %v430_v54 = vpop.permute.xlu1 %429 }
  0xae   : > { %v425_v61 = vpop.permute.xlu0 %424 }
  0xaf   : > { %v420_v62 = vpop.permute.xlu1 %419 }
 0x11b   : > { %v2062_v6 = vpop.f32.mrf.mxu0 }
 0x11c   : > { %v629_v59 = vadd.f32 %v2062_v6, %v430_v54 }
 0x11d   : > { %v2064_v7 = vpop.f32.mrf.mxu0 }
 0x11e   : > { %v685_v2 = vmax.f32 %v629_v59, 0.0  ;;  %v621_v3 = vadd.f32 %v2064_v7, %v420_v62  ;;  %v923_v7 = vld [vmem:[%s2283_s6] sm:$0xff] }
 0x11f   : > { %v2066_v8 = vpop.f32.mrf.mxu0 }
 0x120   : > { %v632_v57 = vadd.f32 %v2066_v8, %v435_v53  ;;  %v683_v6 = vmax.f32 %v621_v3, 0.0  ;;  %v699_v8 = vld [vmem:[%s2280_s3] sm:$0xf] }
 0x121   : > { %v2068_v9 = vpop.f32.mrf.mxu0 }
 0x122   : > { %v686_v63 = vmax.f32 %v632_v57, 0.0  ;;  %v624_v0 = vadd.f32 %v2068_v9, %v425_v61  ;;  %v704_v9 = vpop.permute.xlu0 %703  ;;  %v944_v61 = vld [vmem:[%s2284_s7 + $0x28] sm:$0xff] }
 0x123   : > { %v1543_v10 = vpop.f32.mrf.mxu0 }
 0x124   : > { %v645_v49 = vadd.f32 %v1543_v10, %v450_v38  ;;  %v684_v5 = vmax.f32 %v624_v0, 0.0 }
 0x125   : > { %v636_v11 = vpop.f32.mrf.mxu0 }
 0x126   : > { %v689_v55 = vmax.f32 %v645_v49, 0.0  ;;  %v637_v56 = vadd.f32 %v636_v11, %v440_v46  ;;  %v946_v49 = vld [vmem:[%s2284_s7 + $0x38] sm:$0xff] }
 0x127   : > { %v1544_v14 = vpop.f32.mrf.mxu0 }
 0x128   : > { %v648_v47 = vadd.f32 %v1544_v14, %v455_v37  ;;  %v687_v60 = vmax.f32 %v637_v56, 0.0  ;;  %v1801_v37 = vmov 2102212464  }
 0x129   : > { %v639_v15 = vpop.f32.mrf.mxu0 }
 0x12a   : > { %v690_v51 = vmax.f32 %v648_v47, 0.0  ;;  %v640_v52 = vadd.f32 %v639_v15, %v445_v45 }
 0x12b   : > { %v1547_v16 = vpop.f32.mrf.mxu0 }
 0x12c   : > { %v661_v39 = vadd.f32 %v1547_v16, %v470_v22  ;;  %v688_v58 = vmax.f32 %v640_v52, 0.0  ;;  %v950_v22 = vld [vmem:[%s2284_s7 + $0x58] sm:$0xff] }
 0x12d   : > { %v652_v19 = vpop.f32.mrf.mxu0 }
 0x12e   : > { %v693_v43 = vmax.f32 %v661_v39, 0.0  ;;  %v653_v44 = vadd.f32 %v652_v19, %v460_v29  ;;  %v1798_v29 = vmov 683565275  }
 0x12f   : > { %v1548_v20 = vpop.f32.mrf.mxu0 }
 0x130   : > { %v664_v35 = vadd.f32 %v1548_v20, %v475_v21  ;;  %v691_v50 = vmax.f32 %v653_v44, 0.0  ;;  %v952_v20 = vld [vmem:[%s2284_s7 + $0x68] sm:$0xff] }
 0x131   : > { %v655_v1 = vpop.f32.mrf.mxu0 }
 0x132   : > { %v694_v41 = vmax.f32 %v664_v35, 0.0  ;;  %v656_v42 = vadd.f32 %v655_v1, %v465_v26 }
 0x133   : > { %v1551_v23 = vpop.f32.mrf.mxu0 }
 0x134   : > { %v677_v27 = vadd.f32 %v1551_v23, %v490_v17  ;;  %v692_v48 = vmax.f32 %v656_v42, 0.0 }
 0x135   : > { %v668_v24 = vpop.f32.mrf.mxu0 }
 0x136   : > { %v697_v33 = vmax.f32 %v677_v27, 0.0  ;;  %v669_v34 = vadd.f32 %v668_v24, %v480_v18  ;;  %v954_v18 = vld [vmem:[%s2284_s7 + $0x78] sm:$0xff]  ;;  %v948_v27 = vld [vmem:[%s2284_s7 + $0x48] sm:$0xff] }
 0x137   : > { %v1552_v25 = vpop.f32.mrf.mxu0  ;;  %1032 = vperm.xlu1 %1713, %v954_v18  }
 0x138   : > { %v680_v28 = vadd.f32 %v1552_v25, %v495_v12  ;;  %v695_v40 = vmax.f32 %v669_v34, 0.0  ;;  %v1800_v34 = vmov 2131351028  }
 0x139   : > { %v671_v30 = vpop.f32.mrf.mxu0 }
 0x13a   : > { %v698_v31 = vmax.f32 %v680_v28, 0.0  ;;  %v672_v32 = vadd.f32 %v671_v30, %v485_v13  ;;  %v781_v13 = vpop.permute.xlu1 %780 }
 0x13b   : > { %1022 = vperm.xlu1 %1713, %v952_v20  }
 0x13c   : > { %1554 = vmatpush3.msra.mxu1 %v698_v31  ;;  %v696_v36 = vmax.f32 %v672_v32, 0.0  ;;  %v1799_v31 = vmov 2475754826  }
 0x13d   : > { %1555 = vmatprep.subr.mxu1 %v1795_v4 }
 0x13e   : > { %1556 = vmatpush3.msra.mxu1 %v697_v33 }
 0x13f   : > { %1557 = vmatprep.subr.mxu1 %v1795_v4  ;;  %1012 = vperm.xlu1 %1713, %v950_v22  }
 0x140   : > { %1558 = vmatpush3.msra.mxu1 %v696_v36 }
 0x141   : > { %1559 = vmatprep.subr.mxu1 %v1795_v4 }
 0x142   : > { %1560 = vmatpush3.msra.mxu1 %v695_v40  ;;  %v1802_v40 = vmov 920167782  }
 0x143   : > { %1561 = vmatprep.subr.mxu1 %v1795_v4  ;;  %1002 = vperm.xlu1 %1713, %v948_v27  }
 0x144   : > { %1562 = vmatpush3.msra.mxu1 %v694_v41 }
 0x145   : > { %1563 = vmatprep.subr.mxu1 %v1795_v4 }
 0x146   : > { %1564 = vmatpush3.msra.mxu1 %v693_v43  ;;  %v1803_v43 = vmov 1326507024  }
 0x147   : > { %1565 = vmatprep.subr.mxu1 %v1795_v4  ;;  %992 = vperm.xlu1 %1713, %v946_v49  }
 0x148   : > { %1566 = vmatpush3.msra.mxu1 %v692_v48 }
 0x149   : > { %1567 = vmatprep.subr.mxu1 %v1795_v4 }
 0x14a   : > { %1568 = vmatpush3.msra.mxu1 %v691_v50 }
 0x14b   : > { %1569 = vmatprep.subr.mxu1 %v1795_v4  ;;  %982 = vperm.xlu1 %1713, %v944_v61  }
 0x14c   : > { %1570 = vmatpush3.msra.mxu1 %v690_v51 }
 0x14d   : > { %1571 = vmatprep.subr.mxu1 %v1795_v4 }
 0x14e   : > { %1572 = vmatpush3.msra.mxu1 %v689_v55 }
 0x14f   : > { %1573 = vmatprep.subr.mxu1 %v1795_v4 }
 0x150   : > { %1574 = vmatpush3.msra.mxu1 %v688_v58 }
 0x151   : > { %1575 = vmatprep.subr.mxu1 %v1795_v4 }
 0x152   : > { %1576 = vmatpush3.msra.mxu1 %v687_v60 }
 0x153   : > { %1577 = vmatprep.subr.mxu1 %v1795_v4 }
 0x154   : > { %1578 = vmatpush3.msra.mxu1 %v686_v63 }
 0x155   : > { %1579 = vmatprep.subr.mxu1 %v1795_v4 }
 0x156   : > { %1580 = vmatpush3.msra.mxu1 %v685_v2 }
 0x157   : > { %1581 = vmatprep.subr.mxu1 %v1795_v4 }
 0x158   : > { %1582 = vmatpush3.msra.mxu1 %v684_v5 }
 0x159   : > { %1583 = vmatprep.subr.mxu1 %v1795_v4 }
 0x15a   : > { %1584 = vmatpush3.msra.mxu1 %v683_v6 }
 0x15b   : > { %1586 = vmatmul.mubr.f32.vlgmr.msra.gmra.mxu1 %v699_v8 }
 0x15c   : > { %1590 = vmatprep.mubr.msk.f32.mxu1 %vm1035_vm2, %v923_v7 }
 0x21b   : > { %v772_v10 = vpop.f32.mrf.mxu1 }
 0x21c   : > { %v773_v11 = vadd.f32 %v772_v10, %v704_v9  ;;  %v942_v9 = vld [vmem:[%s2284_s7 + $0x18] sm:$0xff] }
 0x21d   : > { %v1587_v12 = vpop.f32.mrf.mxu1  ;;  %972 = vperm.xlu1 %1713, %v942_v9   ;;  %v927_v9 = vld [vmem:[%s2283_s6 + $0x20] sm:$0xff] }
 0x21e   : > { %1722 = vtanh.f32 %v773_v11 }
 0x22b   : > { %v1723_v14 = vpop.eup %1722 }
 0x22c   : > { %v2096_v15 = vadd.f32 %v1723_v14, %v781_v13  ;;  %v940_v13 = vld [vmem:[%s2284_s7 + $0x8] sm:$0xff] }
 0x22d   : > { %962 = vperm.xlu1 %1713, %v940_v13   ;;  %v931_v13 = vld [vmem:[%s2283_s6 + $0x40] sm:$0xff] }
 0x22e   : > { %v787_v16 = vand.u32 2139095040, %v2096_v15  ;;  %v784_v21 = vand.u32 2147483647, %v2096_v15  ;;  %vm786_vm10 = vcmp.lt.s32.totalorder %v2096_v15, 0  ;;  %vm876_vm15 = vweird.f32 %v2096_v15 }
 0x230   : > { %v788_v17 = vshrl.u32 %v787_v16, 23  ;;  %v791_v25 = vand.u32 8388607, %v784_v21  ;;  %vm785_vm11 = vcmp.le.f32.partialorder %v784_v21, 0.7853982 }
 0x232   : > { %v1429_v19 = vadd.s32 4294967169, %v788_v17  ;;  %v792_v45 = vor.u32 8388608, %v791_v25  ;;  %v1250_v17 = vld [vmem:[%s2286_s9] sm:$0x3] }
 0x233   : > { %1253 = vperm.xlu1 %1713, %v1250_v17   ;;  %v934_v17 = vld [vmem:[%s2283_s6 + $0x58] sm:$0xff] }
 0x234   : > { %v794_v1 = vadd.s32 1, %v1429_v19  ;;  %v832_v60 = vshll.u32 %v792_v45, 8 }
 0x236   : > { %vm795_vm3 = vcmp.gt.s32.totalorder %v794_v1, 0 }
 0x237   : > { %v796_v23 = vsel %vm795_vm3, %v794_v1, 0  ;;  %vm919_vm3 = vcmask 1041408  }
 0x238   : > { %v798_v24 = vand.u32 31, %v796_v23  ;;  %v797_v28 = vshrl.u32 %v796_v23, 5 }
 0x23a   : > { %v799_v26 = vsub.s32 32, %v798_v24  ;;  %v801_v30 = vshll.u32 %v1798_v29, %v798_v24  ;;  %v804_v32 = vshll.u32 %v1799_v31, %v798_v24  ;;  %v807_v36 = vshll.u32 %v1800_v34, %v798_v24 }
 0x23b   : > { %v810_v39 = vshll.u32 %v1801_v37, %v798_v24  ;;  %v813_v42 = vshll.u32 %v1802_v40, %v798_v24  ;;  %vm816_vm4 = vcmp.lt.s32.totalorder %v797_v28, 1  ;;  %vm819_vm5 = vcmp.lt.s32.totalorder %v797_v28, 4 }
 0x23c   : > { %v802_v33 = vshrl.u32 %v1799_v31, %v799_v26  ;;  %v805_v35 = vshrl.u32 %v1800_v34, %v799_v26  ;;  %v808_v38 = vshrl.u32 %v1801_v37, %v799_v26  ;;  %v811_v41 = vshrl.u32 %v1802_v40, %v799_v26 }
 0x23d   : > { %v814_v44 = vshrl.u32 %v1803_v43, %v799_v26  ;;  %v800_v55 = vshrl.u32 %v1798_v29, %v799_v26  ;;  %vm818_vm6 = vcmp.lt.s32.totalorder %v797_v28, 3  ;;  %vm817_vm7 = vcmp.lt.s32.totalorder %v797_v28, 2 }
 0x23e   : > { %v803_v46 = vor.u32 %v802_v33, %v801_v30  ;;  %v806_v47 = vor.u32 %v805_v35, %v804_v32  ;;  %v809_v48 = vor.u32 %v808_v38, %v807_v36  ;;  %v812_v50 = vor.u32 %v811_v41, %v810_v39 }
 0x23f   : > { %v815_v51 = vor.u32 %v814_v44, %v813_v42 }
 0x240   : > { %v821_v52 = vsel %vm819_vm5, %v809_v48, 2102212464  ;;  %v824_v53 = vsel %vm816_vm4, %v803_v46, %v806_v47  ;;  %v828_v54 = vsel %vm816_vm4, %v806_v47, %v809_v48  ;;  %v825_v56 = vsel %vm819_vm5, %v812_v50, 920167782 }
 0x241   : > { %v829_v57 = vsel %vm819_vm5, %v815_v51, 1326507024  ;;  %v826_v58 = vsel %vm818_vm6, %v809_v48, %v825_v56  ;;  %v820_v62 = vsel %vm816_vm4, %v800_v55, %v803_v46  ;;  %v822_v63 = vsel %vm818_vm6, %v806_v47, %v821_v52  ;;  %v889_v51 = vpop.permute.xlu0 %888 }
 0x242   : > { %v830_v59 = vsel %vm818_vm6, %v812_v50, %v829_v57  ;;  %v827_v0 = vsel %vm817_vm7, %v824_v53, %v826_v58  ;;  %v823_v7 = vsel %vm817_vm7, %v820_v62, %v822_v63  ;;  %vm921_vm4 = vcmask 1042432  }
 0x243   : > { %v831_v2 = vsel %vm817_vm7, %v828_v54, %v830_v59  ;;  %v2123_v6 = vmul.u32.u64.low %v832_v60, %v827_v0  ;;  %v2124_v8 = vmul.u32.u64.high %v832_v60, %v827_v0, %v2123_v6  ;;  %v839_v11 = vmul.u32 %v832_v60, %v823_v7  ;;  %v926_v7 = vld [vmem:[%s2283_s6 + $0x18] sm:$0xff] }
 0x244   : > { %v2120_v3 = vmul.u32.u64.low %v832_v60, %v831_v2  ;;  %v2121_v5 = vmul.u32.u64.high %v832_v60, %v831_v2, %v2120_v3  ;;  %vm1084_vm5 = vcmask 1043456  }
 0x245   : > { %v842_v10 = vadd.s32 1, %v2124_v8 }
 0x246   : > { %vm841_vm8 = vc.u32 %v2121_v5, %v2123_v6  ;;  %v840_v26 = vadd.s32 %v2123_v6, %v2121_v5  ;;  %v924_v6 = vld [vmem:[%s2283_s6 + $0x8] sm:$0xff] }
 0x247   : > { %v843_v12 = vsel %vm841_vm8, %v842_v10, %v2124_v8  ;;  %v925_v8 = vld [vmem:[%s2283_s6 + $0x10] sm:$0xff]  ;;  %v928_v10 = vld [vmem:[%s2283_s6 + $0x28] sm:$0xff] }
 0x248   : > { %v844_v14 = vadd.s32 %v843_v12, %v839_v11  ;;  %v929_v11 = vld [vmem:[%s2283_s6 + $0x30] sm:$0xff]  ;;  %v930_v12 = vld [vmem:[%s2283_s6 + $0x38] sm:$0xff] }
 0x24a   : > { %v845_v16 = vadd.s32 536870912, %v844_v14 }
 0x24c   : > { %v846_v18 = vshrl.u32 %v845_v16, 30  ;;  %v933_v16 = vld [vmem:[%s2283_s6 + $0x50] sm:$0xff] }
 0x24e   : > { %v847_v19 = vshll.u32 %v846_v18, 30  ;;  %v870_v41 = vsub.s32 4, %v846_v18 }
 0x250   : > { %v848_v20 = vsub.s32 %v844_v14, %v847_v19  ;;  %v871_v42 = vsel %vm786_vm10, %v870_v41, %v846_v18  ;;  %v932_v14 = vld [vmem:[%s2283_s6 + $0x48] sm:$0xff]  ;;  %v935_v18 = vld [vmem:[%s2283_s6 + $0x60] sm:$0xff] }
 0x251   : > { %v873_v43 = vsel %vm785_vm11, 0, %v871_v42  ;;  %v936_v19 = vld [vmem:[%s2283_s6 + $0x68] sm:$0xff] }
 0x252   : > { %v850_v1 = vsub.s32 0, %v848_v20  ;;  %v877_v44 = vand.u32 3, %v873_v43 }
 0x254   : > { %v1430_v22 = vmin.u32 %v850_v1, %v848_v20  ;;  %vm882_vm12 = vcmp.eq.s32.totalorder %v877_v44, 2  ;;  %vm879_vm13 = vcmp.eq.s32.totalorder %v877_v44, 0  ;;  %vm878_vm14 = vcmp.lt.s32.totalorder %v877_v44, 2  ;;  %v938_v1 = vld [vmem:[%s2283_s6 + $0x78] sm:$0xff] }
 0x256   : > { %v852_v23 = vclz %v1430_v22 }
 0x258   : > { %v1431_v24 = vadd.s32 4294967294, %v852_v23 }
 0x25a   : > { %vm1432_vm9 = vcmp.lt.s32.totalorder %v1431_v24, 0 }
 0x25b   : > { %v855_v25 = vsel %vm1432_vm9, 0, %v1431_v24 }
 0x25c   : > { %v856_v27 = vsub.s32 32, %v855_v25  ;;  %v860_v28 = vsub.s32 4294967266, %v855_v25  ;;  %v857_v29 = vshll.u32 %v848_v20, %v855_v25  ;;  %v937_v20 = vld [vmem:[%s2283_s6 + $0x70] sm:$0xff] }
 0x25e   : > { %v858_v30 = vshrl.u32 %v840_v26, %v856_v27  ;;  %v861_v31 = vadd.s32 127, %v860_v28  ;;  %v1033_v27 = vpop.permute.xlu1 %1032 }
 0x260   : > { %v859_v32 = vor.u32 %v858_v30, %v857_v29  ;;  %v862_v33 = vshll.u32 %v861_v31, 23  ;;  %v1028_v30 = vpop.permute.xlu0 %1027 }
 0x262   : > { %v863_v34 = vor.u32 4788187, %v862_v33  ;;  %v866_v36 = vcvt.s32.f32 %v859_v32  ;;  %v1023_v32 = vpop.permute.xlu1 %1022 }
 0x264   : > { %v864_v35 = vand.u32 2147483647, %v863_v34 }
 0x266   : > { %v867_v37 = vmul.f32 %v866_v36, %v864_v35  ;;  %v1018_v35 = vpop.permute.xlu0 %1017 }
 0x268   : > { %v868_v38 = vxor.u32 2147483648, %v867_v37 }
 0x26a   : > { %v869_v39 = vsel %vm786_vm10, %v868_v38, %v867_v37  ;;  %v1013_v37 = vpop.permute.xlu1 %1012 }
 0x26b   : > { %v872_v40 = vsel %vm785_vm11, %v2096_v15, %v869_v39 }
 0x26c   : > { %1724 = vcosq.f32 %v872_v40 }
 0x26d   : > { %1726 = vsinq.f32 %v872_v40  ;;  %v1008_v40 = vpop.permute.xlu0 %1007 }
 0x26e   : > { %v1003_v42 = vpop.permute.xlu1 %1002 }
 0x279   : > { %v1725_v45 = vpop.eup %1724 }
 0x27a   : > { %v1727_v46 = vpop.eup %1726  ;;  %v883_v47 = vxor.u32 2147483648, %v1725_v45 }
 0x27b   : > { %v880_v48 = vxor.u32 2147483648, %v1727_v46 }
 0x27c   : > { %v884_v49 = vsel %vm882_vm12, %v883_v47, %v1727_v46 }
 0x27d   : > { %v881_v50 = vsel %vm879_vm13, %v1725_v45, %v880_v48 }
 0x27e   : > { %v885_v21 = vsel %vm878_vm14, %v881_v50, %v884_v49  ;;  %v998_v49 = vpop.permute.xlu0 %997 }
 0x27f   : > { %v886_v52 = vsel %vm876_vm15, nan, %v885_v21 }
 0x280   : > { %v891_v53 = vmul.f32 %v889_v51, %v886_v52  ;;  %v993_v51 = vpop.permute.xlu1 %992 }
 0x282   : > { %v893_v54 = vrot.slane %v891_v53, 1  ;;  %v896_v56 = vrot.slane %v891_v53, 2  ;;  %v899_v58 = vrot.slane %v891_v53, 3 }
 0x284   : > { %v895_v55 = vmul.f32 %v893_v54, %v891_v53 }
 0x286   : > { %v898_v57 = vmul.f32 %v896_v56, %v895_v55  ;;  %v903_v59 = vrot.slane %v895_v55, 1  ;;  %v909_v63 = vrot.slane %v895_v55, 7  ;;  %v988_v56 = vpop.permute.xlu0 %987 }
 0x288   : > { %v901_v60 = vmul.f32 %v899_v58, %v898_v57  ;;  %v905_v61 = vmul.f32 %v903_v59, %v891_v53  ;;  %v912_v0 = vrot.slane %v898_v57, 6  ;;  %v983_v59 = vpop.permute.xlu1 %982 }
 0x28a   : > { %v907_v62 = vrot.slane %v905_v61, 1  ;;  %v915_v2 = vrot.slane %v901_v60, 5 }
 0x28c   : > { %v918_v15 = vsel %vm917_vm0, %v907_v62, %v909_v63 }
 0x28d   : > { %v920_v3 = vsel %vm919_vm3, %v918_v15, %v912_v0  ;;  %v978_v0 = vpop.permute.xlu0 %977 }
 0x28e   : > { %v922_v5 = vsel %vm921_vm4, %v920_v3, %v915_v2 }
 0x28f   : > { %1588 = vmatprep.subr.msk.mxu1 %vm1084_vm5, %v922_v5 }
 0x290   : > { %1589 = vmatpush3.msk.msra.mxu1 %vm1084_vm5, %v922_v5 }
 0x291   : > { %1591 = vmatmul.mubr.msk.f32.vlgmr.msra.gmra.mxu1 %vm1035_vm2, %v924_v6  ;;  %1614 = vmatprep.subr.mxu1 %v1795_v4 }
 0x292   : > { %1593 = vmatprep.mubr.msk.f32.mxu1 %vm1035_vm2, %v925_v8 }
 0x295   : > { %1594 = vmatmul.mubr.msk.f32.gmra.mxu1 %vm1035_vm2, %v926_v7 }
 0x296   : > { %1596 = vmatprep.mubr.msk.f32.mxu1 %vm1035_vm2, %v927_v9  ;;  %v968_v9 = vpop.permute.xlu0 %967 }
 0x298   : > { %v973_v3 = vpop.permute.xlu1 %972 }
 0x299   : > { %1597 = vmatmul.mubr.msk.f32.gmra.mxu1 %vm1035_vm2, %v928_v10 }
 0x29a   : > { %1599 = vmatprep.mubr.msk.f32.mxu1 %vm1035_vm2, %v929_v11 }
 0x29d   : > { %1600 = vmatmul.mubr.msk.f32.gmra.mxu1 %vm1035_vm2, %v930_v12 }
 0x29e   : > { %1602 = vmatprep.mubr.msk.f32.mxu1 %vm1035_vm2, %v931_v13 }
 0x2a1   : > { %1603 = vmatmul.mubr.msk.f32.gmra.mxu1 %vm1035_vm2, %v932_v14 }
 0x2a2   : > { %1605 = vmatprep.mubr.msk.f32.mxu1 %vm1035_vm2, %v933_v16 }
 0x2a5   : > { %1606 = vmatmul.mubr.msk.f32.gmra.mxu1 %vm1035_vm2, %v934_v17 }
 0x2a6   : > { %1608 = vmatprep.mubr.msk.f32.mxu1 %vm1035_vm2, %v935_v18  ;;  %v958_v18 = vpop.permute.xlu0 %957 }
 0x2a8   : > { %v963_v12 = vpop.permute.xlu1 %962 }
 0x2a9   : > { %1609 = vmatmul.mubr.msk.f32.gmra.mxu1 %vm1035_vm2, %v936_v19 }
 0x2aa   : > { %1611 = vmatprep.mubr.msk.f32.mxu1 %vm1035_vm2, %v937_v20 }
 0x2ad   : > { %1612 = vmatmul.mubr.msk.f32.gmra.mxu1 %vm1035_vm2, %v938_v1 }
 0x2ae   : > { %1646 = vmatprep.mubr.msk.f32.mxu1 %vm1796_vm1, %v1795_v4 }
 0x351   : > { %v2207_v22 = vpop.f32.mrf.mxu1 }
 0x352   : > { %v1160_v16 = vadd.f32 %v2207_v22, %v963_v12  ;;  %v1249_v22 = vld [vmem:[%s2285_s8] sm:$0x3] }
 0x353   : > { %v2209_v23 = vpop.f32.mrf.mxu1 }
 0x354   : > { %v1155_v19 = vadd.f32 %v2209_v23, %v958_v18  ;;  %v1234_v1 = vmax.f32 %v1160_v16, 0.0  ;;  %v1254_v23 = vpop.permute.xlu1 %1253 }
 0x355   : > { %v2211_v24 = vpop.f32.mrf.mxu1 }
 0x356   : > { %v1170_v10 = vadd.f32 %v2211_v24, %v973_v3  ;;  %v1233_v24 = vmax.f32 %v1155_v19, 0.0 }
 0x357   : > { %v2213_v25 = vpop.f32.mrf.mxu1 }
 0x358   : > { %v1165_v13 = vadd.f32 %v2213_v25, %v968_v9  ;;  %v1236_v17 = vmax.f32 %v1170_v10, 0.0 }
 0x359   : > { %v1598_v26 = vpop.f32.mrf.mxu1 }
 0x35a   : > { %v1180_v5 = vadd.f32 %v1598_v26, %v983_v59  ;;  %v1235_v20 = vmax.f32 %v1165_v13, 0.0 }
 0x35b   : > { %v1174_v28 = vpop.f32.mrf.mxu1 }
 0x35c   : > { %v1175_v8 = vadd.f32 %v1174_v28, %v978_v0  ;;  %v1238_v11 = vmax.f32 %v1180_v5, 0.0 }
 0x35d   : > { %v1601_v29 = vpop.f32.mrf.mxu1 }
 0x35e   : > { %v1190_v62 = vadd.f32 %v1601_v29, %v993_v51  ;;  %v1237_v14 = vmax.f32 %v1175_v8, 0.0 }
 0x35f   : > { %v1184_v31 = vpop.f32.mrf.mxu1 }
 0x360   : > { %v1185_v2 = vadd.f32 %v1184_v31, %v988_v56  ;;  %v1240_v6 = vmax.f32 %v1190_v62, 0.0 }
 0x361   : > { %v1604_v33 = vpop.f32.mrf.mxu1 }
 0x362   : > { %v1200_v57 = vadd.f32 %v1604_v33, %v1003_v42  ;;  %v1239_v7 = vmax.f32 %v1185_v2, 0.0 }
 0x363   : > { %v1194_v34 = vpop.f32.mrf.mxu1 }
 0x364   : > { %v1195_v60 = vadd.f32 %v1194_v34, %v998_v49  ;;  %v1242_v63 = vmax.f32 %v1200_v57, 0.0 }
 0x365   : > { %v1607_v36 = vpop.f32.mrf.mxu1 }
 0x366   : > { %v1210_v52 = vadd.f32 %v1607_v36, %v1013_v37  ;;  %v1241_v15 = vmax.f32 %v1195_v60, 0.0 }
 0x367   : > { %v1204_v38 = vpop.f32.mrf.mxu1 }
 0x368   : > { %v1205_v54 = vadd.f32 %v1204_v38, %v1008_v40  ;;  %v1244_v58 = vmax.f32 %v1210_v52, 0.0 }
 0x369   : > { %v1610_v39 = vpop.f32.mrf.mxu1 }
 0x36a   : > { %v1220_v46 = vadd.f32 %v1610_v39, %v1023_v32  ;;  %v1243_v61 = vmax.f32 %v1205_v54, 0.0 }
 0x36b   : > { %v1214_v41 = vpop.f32.mrf.mxu1 }
 0x36c   : > { %v1215_v50 = vadd.f32 %v1214_v41, %v1018_v35  ;;  %v1246_v53 = vmax.f32 %v1220_v46, 0.0 }
 0x36d   : > { %v1613_v43 = vpop.f32.mrf.mxu1 }
 0x36e   : > { %v1230_v44 = vadd.f32 %v1613_v43, %v1033_v27  ;;  %v1245_v55 = vmax.f32 %v1215_v50, 0.0 }
 0x36f   : > { %v1224_v45 = vpop.f32.mrf.mxu1 }
 0x370   : > { %v1248_v47 = vmax.f32 %v1230_v44, 0.0  ;;  %v1225_v48 = vadd.f32 %v1224_v45, %v1028_v30 }
 0x372   : > { %v1247_v21 = vmax.f32 %v1225_v48, 0.0  ;;  %1615 = vmatpush3.msra.mxu1 %v1248_v47 }
 0x373   : > { %1616 = vmatprep.subr.mxu1 %v1795_v4 }
 0x374   : > { %1617 = vmatpush3.msra.mxu1 %v1247_v21 }
 0x375   : > { %1618 = vmatprep.subr.mxu1 %v1795_v4 }
 0x376   : > { %1619 = vmatpush3.msra.mxu1 %v1246_v53 }
 0x377   : > { %1620 = vmatprep.subr.mxu1 %v1795_v4 }
 0x378   : > { %1621 = vmatpush3.msra.mxu1 %v1245_v55 }
 0x379   : > { %1622 = vmatprep.subr.mxu1 %v1795_v4 }
 0x37a   : > { %1623 = vmatpush3.msra.mxu1 %v1244_v58 }
 0x37b   : > { %1624 = vmatprep.subr.mxu1 %v1795_v4 }
 0x37c   : > { %1625 = vmatpush3.msra.mxu1 %v1243_v61 }
 0x37d   : > { %1626 = vmatprep.subr.mxu1 %v1795_v4 }
 0x37e   : > { %1627 = vmatpush3.msra.mxu1 %v1242_v63 }
 0x37f   : > { %1628 = vmatprep.subr.mxu1 %v1795_v4 }
 0x380   : > { %1629 = vmatpush3.msra.mxu1 %v1241_v15 }
 0x381   : > { %1630 = vmatprep.subr.mxu1 %v1795_v4 }
 0x382   : > { %1631 = vmatpush3.msra.mxu1 %v1240_v6 }
 0x383   : > { %1632 = vmatprep.subr.mxu1 %v1795_v4 }
 0x384   : > { %1633 = vmatpush3.msra.mxu1 %v1239_v7 }
 0x385   : > { %1634 = vmatprep.subr.mxu1 %v1795_v4 }
 0x386   : > { %1635 = vmatpush3.msra.mxu1 %v1238_v11 }
 0x387   : > { %1636 = vmatprep.subr.mxu1 %v1795_v4 }
 0x388   : > { %1637 = vmatpush3.msra.mxu1 %v1237_v14 }
 0x389   : > { %1638 = vmatprep.subr.mxu1 %v1795_v4 }
 0x38a   : > { %1639 = vmatpush3.msra.mxu1 %v1236_v17 }
 0x38b   : > { %1640 = vmatprep.subr.mxu1 %v1795_v4 }
 0x38c   : > { %1641 = vmatpush3.msra.mxu1 %v1235_v20 }
 0x38d   : > { %1642 = vmatprep.subr.mxu1 %v1795_v4 }
 0x38e   : > { %1643 = vmatpush3.msra.mxu1 %v1234_v1 }
 0x38f   : > { %1644 = vmatprep.subr.mxu1 %v1795_v4 }
 0x390   : > { %1645 = vmatpush3.msra.mxu1 %v1233_v24 }
 0x391   : > { %1647 = vmatmul.mubr.f32.vlgmr.msra.gmra.mxu1 %v1249_v22 }
 0x451   : > { %v1322_v25 = vpop.f32.mrf.mxu1 }
 0x452   : > { %v1323_v26 = vadd.f32 %v1322_v25, %v1254_v23 }
 0x453   : > { %v1648_v27 = vpop.f32.mrf.mxu1 }
 0x454   : > { %v1326_v28 = vsub.f32 0.0, %v1323_v26 }
 0x456   : > { %v1327_v29 = vmul.f32 1.442695, %v1326_v28 }
 0x458   : > { %1728 = vpow2.f32 %v1327_v29 }
 0x465   : > { %v1729_v30 = vpop.eup %1728 }
 0x466   : > { %v1329_v31 = vadd.f32 1.0, %v1729_v30 }
 0x468   : > { %1730 = vrcp.f32 %v1329_v31 }
 0x475   : > { %v1731_v4 = vpop.eup %1730 }
 0x476   : > { %1332 = vst [vmem:[%s353_s26] sm:$0x3] %v1731_v4 }
 0x477   : > { %1745 = shalt.err (!%p1742_p3)
}
 0x478   : > { %s1746_s11 = scalar_lea.hbm %s2242_s30, 32  ;;  %s1750_s26 = scalar_lea.hbm %s2287_s10, 64 }
 0x479   : > { %p1747_p4 = scmp.ne.s32.totalorder %s2242_s30, %s1746_s11  ;;  %p1751_p9 = scmp.lt.s32.totalorder %s2242_s30, %s2287_s10 }
 0x47a   : > { %p1752_p10 = scmp.lt.s32.totalorder %s1750_s26, %s1746_s11 }
 0x47b   : > { %p1748_p7 = pnand %p1747_p4, %p1898_p5 }
 0x47c   : > { %p1753_p11 = por %p1752_p10, %p1751_p9 }
 0x47d   : > { %p1749_p8 = pneg %p1748_p7 }
 0x47f   : > { %p1754_p12 = pnand %p1753_p11, %p1749_p8 }
 0x481   : > { %1757 = shalt.err (!%p1754_p12)
}
 0x482   : > { %1661 = dma.vmem_to_hbm [thread:$0]  (%p1898_p5), %s1348_s27, 32, %s2242_s30, %s1334_s12  }
 0x483 PF: > { %p1667_p13 = scmp.ge.s32.totalorder %s1792_s16, 2  ;;  %s1359_s0 = sand.u32 1, %s1780_s13  }
 0x484   : > { %s1360_s18 = scalar_lea.sflag [#allocation3], %s1359_s0 }
 0x485   : > { %p1664_p0 = pnand %p1667_p13, %p1902_p6 }
 0x487   : > { %p1665_p1 = pneg %p1664_p0 }
 0x489   : > { %1775 = dma.done.wait (%p1665_p1), %s1360_s18, 32  }
 0x48a   : > { %1777 = vsyncadd (%p1665_p1), %s1360_s18, 4294967264  ;;  %p20_p2 = scmp.ge.s32.totalorder %s1885_s19, 4   ;;  %s2292_s13 = smov %s1784_s14 }
 0x48b   : > { %s2293_s14 = smov %s1788_s15  ;;  %s2294_s15 = smov %s1896_s22 }
 0x48c   : > { %s2295_s16 = smov %s1885_s19  ;;  %22 = sbr.rel (!%p20_p2) target bundleno = 5 (0x5), region = 95 }
 0x491   :  { %1365 = vsyncpa [#allocation3], 1 }
 0x492   :  { %1367 = vsyncpa [#allocation3 + $0x1], 1 }

</bundles_post_ra>
